<compile_context>
chip_gen: v7x
topology: tpu7x:2x2x1
jax: 0.10.0
libtpu: 0.0.40
codegen_flags: <defaults>
</compile_context>

<pallas_src>
import functools

import jax
import jax.numpy as jnp
from jax.experimental import pallas as pl
from jax.experimental.pallas import tpu as pltpu

TILE_MAX = 8192        # pixels (lanes) per grid step; sweep 8192-16384
SUBLANE_PACK = 16      # bf16 sublane tile: packed rgb+nir channels pad to 16


def _round_up(x, m):
    return ((x + m - 1) // m) * m


# ----------------------------------------------------------------------------
# Numerically stable BCE-with-logits, elementwise (matches nn.BCEWithLogitsLoss)
# ----------------------------------------------------------------------------
def _bce_elem(x, y):
    return jnp.maximum(x, 0.0) - x * y + jnp.log1p(jnp.exp(-jnp.abs(x)))


# ----------------------------------------------------------------------------
# Fused kernel: both branches in ONE block-diagonal matmul pair + fusion +
# weighted-BCE partials, one HBM pass.
#   x  (16, TILE) bf16   packed [rgb(0:c) | nir(c:2c) | zero pad] channels
#   t  (1, TILE)  f32    target
#   w1 (2*hid, 16) bf16  block-diagonal, b1 (2*hid, 1) f32
#   w2 (2, 2*hid)  bf16  detection rows only, b2 (2, 1) f32
#   out (1, TILE) f32    fused detection logits; loss partial (1, 128) f32
# ----------------------------------------------------------------------------
def dual_cpd_kernel(x_ref, t_ref, w1_ref, b1_ref, w2_ref, b2_ref,
                    out_ref, loss_ref, *, n_valid, tile):
    # Single matmul pair covers both branches (MXU bf16 in, f32 accumulate).
    h = jnp.dot(w1_ref[...], x_ref[...], preferred_element_type=jnp.float32)
    h = jnp.maximum(h + b1_ref[...], 0.0)                       # (2*hid, TILE)
    y = jnp.dot(w2_ref[...], h.astype(jnp.bfloat16),
                preferred_element_type=jnp.float32) + b2_ref[...]  # (2, TILE)

    r = y[0:1, :]            # branch1 (rgb) detection logits
    n = y[1:2, :]            # branch2 (nir) detection logits
    t = t_ref[...]

    avg = (r + n) * 0.5
    out_ref[...] = avg       # lane-dense (1, TILE) store

    # Weighted elementwise BCE; all three terms share one lane reduction.
    wbce = (0.5 * _bce_elem(avg, t)
            + 0.25 * _bce_elem(r, t)
            + 0.25 * _bce_elem(n, t))

    # Mask tail padding (only emitted when HW % tile != 0; padded image/target
    # lanes are zeros so values are finite, they just must not count).
    if n_valid % tile != 0:
        gidx = (pl.program_id(1) * tile
                + jax.lax.broadcasted_iota(jnp.int32, (1, tile), 1))
        wbce = jnp.where(gidx < n_valid, wbce, 0.0)

    # One reduce per tile; scalar lands in lane 0 of this tile's partial slot so
    # both grid axes stay "parallel" (usable across v7x's two TensorCores).
    part = jnp.sum(wbce, axis=1, keepdims=True)                  # (1, 1)
    lane = jax.lax.broadcasted_iota(jnp.int32, (1, 128), 1)
    loss_ref[...] = jnp.where(lane == 0, part, 0.0)


# ----------------------------------------------------------------------------
# Pack the two branch parameter sets into block-diagonal weights (detection
# row only) so the kernel runs one matmul pair instead of two.
# ----------------------------------------------------------------------------
def _pack_params(params, c, pack_c):
    w1r, b1r, w2r, b2r = params["branch1"]
    w1n, b1n, w2n, b2n = params["branch2"]
    hid = w1r.shape[0]

    w1 = jnp.zeros((2 * hid, pack_c), jnp.float32)
    w1 = w1.at[:hid, :c].set(w1r)            # branch1 sees rgb channels
    w1 = w1.at[hid:, c:2 * c].set(w1n)       # branch2 sees nir channels
    b1 = jnp.concatenate([b1r, b1n], axis=0)                     # (2*hid, 1)

    # Detection row only (row 1 of each branch head); attention row dropped.
    w2 = jnp.zeros((2, 2 * hid), jnp.float32)
    w2 = w2.at[0, :hid].set(w2r[1])
    w2 = w2.at[1, hid:].set(w2n[1])
    b2 = jnp.stack([b2r[1], b2n[1]], axis=0)                     # (2, 1)

    return (w1.astype(jnp.bfloat16), b1, w2.astype(jnp.bfloat16), b2)


# ----------------------------------------------------------------------------
# Wrapper: single packing pass, fused pallas_call, tiny epilogue reduction.
# ----------------------------------------------------------------------------
@jax.jit
def dual_cpd_forward(rgb, nir, target, params):
    b, c, h, w = rgb.shape
    hw = h * w
    pack_c = _round_up(max(2 * c, 1), SUBLANE_PACK)

    tile = TILE_MAX if hw >= TILE_MAX else _round_up(hw, 128)
    num_tiles = pl.cdiv(hw, tile)
    hw_pad = num_tiles * tile

    # One fused pass: concat rgb+nir channels, cast bf16, flatten pixels, pad.
    x = jnp.concatenate([rgb, nir], axis=1).astype(jnp.bfloat16)
    x = x.reshape(b, 2 * c, hw)
    x = jnp.pad(x, ((0, 0), (0, pack_c - 2 * c), (0, hw_pad - hw)))

    t = jnp.pad(target.reshape(b, 1, hw).astype(jnp.float32),
                ((0, 0), (0, 0), (0, hw_pad - hw)))

    w1, b1, w2, b2 = _pack_params(params, c, pack_c)
    hid2 = w1.shape[0]

    kernel = functools.partial(dual_cpd_kernel, n_valid=hw, tile=tile)
    resident = lambda shape: pl.BlockSpec(shape, lambda bi, i: (0, 0))

    out_flat, loss_parts = pl.pallas_call(
        kernel,
        out_shape=(jax.ShapeDtypeStruct((b, 1, hw_pad), jnp.float32),
                   jax.ShapeDtypeStruct((b, 1, num_tiles * 128), jnp.float32)),
        grid_spec=pltpu.PrefetchScalarGridSpec(
            num_scalar_prefetch=0,
            grid=(b, num_tiles),
            in_specs=[
                pl.BlockSpec((None, pack_c, tile), lambda bi, i: (bi, 0, i)),
                pl.BlockSpec((None, 1, tile), lambda bi, i: (bi, 0, i)),
                resident((hid2, pack_c)), resident((hid2, 1)),
                resident((2, hid2)), resident((2, 1)),
            ],
            out_specs=(pl.BlockSpec((None, 1, tile), lambda bi, i: (bi, 0, i)),
                       pl.BlockSpec((None, 1, 128), lambda bi, i: (bi, 0, i))),
        ),
        compiler_params=pltpu.CompilerParams(
            dimension_semantics=("parallel", "parallel"),
            vmem_limit_bytes=32 * 1024 * 1024),   # ample vs ~4-6 MB/step usage
    )(x, t, w1, b1, w2, b2)

    output = out_flat[:, :, :hw].reshape(b, 1, h, w)   # back to NCHW
    loss = jnp.sum(loss_parts) / (b * hw)              # mean over B*1*H*W
    return output, loss


# ----------------------------------------------------------------------------
# Parameter init for the branch stand-ins.
# ----------------------------------------------------------------------------
def init_params(key, in_channels=3, hidden=32):
    def branch_params(k):
        k1, k2, k3, k4 = jax.random.split(k, 4)
        w1 = 0.1 * jax.random.normal(k1, (hidden, in_channels), jnp.float32)
        b1 = 0.1 * jax.random.normal(k2, (hidden, 1), jnp.float32)
        w2 = 0.1 * jax.random.normal(k3, (2, hidden), jnp.float32)  # [attn, det]
        b2 = 0.1 * jax.random.normal(k4, (2, 1), jnp.float32)
        return (w1, b1, w2, b2)

    kb1, kb2 = jax.random.split(key, 2)
    return {"branch1": branch_params(kb1), "branch2": branch_params(kb2)}


if __name__ == "__main__":
    B, C, H, W = 2, 3, 16, 16          # HW = 256 -> one 256-lane tile per image
    key = jax.random.PRNGKey(0)
    k_rgb, k_nir, k_tgt, k_par = jax.random.split(key, 4)

    rgb = jax.random.normal(k_rgb, (B, C, H, W), jnp.float32)
    nir = jax.random.normal(k_nir, (B, C, H, W), jnp.float32)
    target = (jax.random.uniform(k_tgt, (B, 1, H, W)) > 0.5).astype(jnp.float32)

    params = init_params(k_par, in_channels=C, hidden=32)

    output, loss = dual_cpd_forward(rgb, nir, target, params)
    jax.block_until_ready((output, loss))

    assert output.shape == (B, 1, H, W)
    assert loss.shape == ()
    assert bool(jnp.isfinite(loss))
    print("KERNEL_OK")
</pallas_src>

<mosaic_0001>
module attributes {stable_mosaic.version = 11 : i64} {
  func.func @dual_cpd_kernel(%arg0: i32, %arg1: i32, %arg2: memref<1x16x256xbf16, #tpu.memory_space<vmem>>, %arg3: memref<1x1x256xf32, #tpu.memory_space<vmem>>, %arg4: memref<64x16xbf16, #tpu.memory_space<vmem>>, %arg5: memref<64x1xf32, #tpu.memory_space<vmem>>, %arg6: memref<2x64xbf16, #tpu.memory_space<vmem>>, %arg7: memref<2x1xf32, #tpu.memory_space<vmem>>, %arg8: memref<1x1x256xf32, #tpu.memory_space<vmem>>, %arg9: memref<1x1x128xf32, #tpu.memory_space<vmem>>) attributes {dimension_semantics = [#tpu.dimension_semantics<parallel>, #tpu.dimension_semantics<parallel>], iteration_bounds = array<i64: 2, 1>, scalar_prefetch = 0 : i64, scratch_operands = 0 : i64, tpu.core_type = #tpu.core_type<tc>, window_params = [{transform_indices = @transform_0, window_bounds = array<i64: 1, 16, 256>}, {transform_indices = @transform_1, window_bounds = array<i64: 1, 1, 256>}, {pipeline_mode = #tpu.pipeline_mode<synchronous>, transform_indices = @transform_2, window_bounds = array<i64: 64, 16>}, {pipeline_mode = #tpu.pipeline_mode<synchronous>, transform_indices = @transform_3, window_bounds = array<i64: 64, 1>}, {pipeline_mode = #tpu.pipeline_mode<synchronous>, transform_indices = @transform_4, window_bounds = array<i64: 2, 64>}, {pipeline_mode = #tpu.pipeline_mode<synchronous>, transform_indices = @transform_5, window_bounds = array<i64: 2, 1>}, {transform_indices = @transform_6, window_bounds = array<i64: 1, 1, 256>}, {transform_indices = @transform_7, window_bounds = array<i64: 1, 1, 128>}]} {
    %c0 = arith.constant 0 : index
    %c0_0 = arith.constant 0 : index
    %0 = vector.load %arg4[%c0, %c0_0] : memref<64x16xbf16, #tpu.memory_space<vmem>>, vector<64x16xbf16>
    %c0_1 = arith.constant 0 : index
    %c0_2 = arith.constant 0 : index
    %c0_3 = arith.constant 0 : index
    %1 = vector.load %arg2[%c0_1, %c0_2, %c0_3] : memref<1x16x256xbf16, #tpu.memory_space<vmem>>, vector<1x16x256xbf16>
    %2 = vector.shape_cast %1 : vector<1x16x256xbf16> to vector<16x256xbf16>
    %cst = arith.constant dense<0.000000e+00> : vector<64x256xf32>
    %3 = tpu.matmul %0, %2, %cst {dimension_numbers = #tpu.dot_dimension_numbers<[1], [0], [0], [1], [0, 0, 1, 1], [], []>} : vector<64x16xbf16>, vector<16x256xbf16>, vector<64x256xf32> -> vector<64x256xf32>
    %c0_4 = arith.constant 0 : index
    %c0_5 = arith.constant 0 : index
    %4 = vector.load %arg5[%c0_4, %c0_5] : memref<64x1xf32, #tpu.memory_space<vmem>>, vector<64x1xf32>
    %5 = vector.broadcast %4 : vector<64x1xf32> to vector<64x256xf32>
    %6 = arith.addf %3, %5 : vector<64x256xf32>
    %cst_6 = arith.constant 0.000000e+00 : f32
    %7 = vector.broadcast %cst_6 : f32 to vector<64x256xf32>
    %8 = arith.maximumf %6, %7 : vector<64x256xf32>
    %c0_7 = arith.constant 0 : index
    %c0_8 = arith.constant 0 : index
    %9 = vector.load %arg6[%c0_7, %c0_8] : memref<2x64xbf16, #tpu.memory_space<vmem>>, vector<2x64xbf16>
    %10 = arith.truncf %8 : vector<64x256xf32> to vector<64x256xbf16>
    %cst_9 = arith.constant dense<0.000000e+00> : vector<2x256xf32>
    %11 = tpu.matmul %9, %10, %cst_9 {dimension_numbers = #tpu.dot_dimension_numbers<[1], [0], [0], [1], [0, 0, 1, 1], [], []>} : vector<2x64xbf16>, vector<64x256xbf16>, vector<2x256xf32> -> vector<2x256xf32>
    %c0_10 = arith.constant 0 : index
    %c0_11 = arith.constant 0 : index
    %12 = vector.load %arg7[%c0_10, %c0_11] : memref<2x1xf32, #tpu.memory_space<vmem>>, vector<2x1xf32>
    %13 = vector.broadcast %12 : vector<2x1xf32> to vector<2x256xf32>
    %14 = arith.addf %11, %13 : vector<2x256xf32>
    %15 = vector.extract_strided_slice %14 {offsets = [0, 0], sizes = [1, 256], strides = [1, 1]} : vector<2x256xf32> to vector<1x256xf32>
    %16 = vector.extract_strided_slice %14 {offsets = [1, 0], sizes = [1, 256], strides = [1, 1]} : vector<2x256xf32> to vector<1x256xf32>
    %c0_12 = arith.constant 0 : index
    %c0_13 = arith.constant 0 : index
    %c0_14 = arith.constant 0 : index
    %17 = vector.load %arg3[%c0_12, %c0_13, %c0_14] : memref<1x1x256xf32, #tpu.memory_space<vmem>>, vector<1x1x256xf32>
    %18 = vector.shape_cast %17 : vector<1x1x256xf32> to vector<1x256xf32>
    %19 = arith.addf %15, %16 : vector<1x256xf32>
    %cst_15 = arith.constant 5.000000e-01 : f32
    %20 = vector.broadcast %cst_15 : f32 to vector<1x256xf32>
    %21 = arith.mulf %19, %20 : vector<1x256xf32>
    %c0_16 = arith.constant 0 : index
    %c0_17 = arith.constant 0 : index
    %c0_18 = arith.constant 0 : index
    %22 = vector.load %arg8[%c0_16, %c0_17, %c0_18] : memref<1x1x256xf32, #tpu.memory_space<vmem>>, vector<1x1x256xf32>
    %23 = vector.shape_cast %22 : vector<1x1x256xf32> to vector<1x256xf32>
    %24 = vector.shape_cast %21 : vector<1x256xf32> to vector<1x1x256xf32>
    tpu.vector_store %arg8[%c0_16, %c0_17, %c0_18], %24 {strides = array<i32>} : memref<1x1x256xf32, #tpu.memory_space<vmem>>, vector<1x1x256xf32>,
    %cst_19 = arith.constant 0.000000e+00 : f32
    %25 = vector.broadcast %cst_19 : f32 to vector<1x256xf32>
    %26 = arith.maximumf %21, %25 : vector<1x256xf32>
    %27 = arith.mulf %21, %18 : vector<1x256xf32>
    %28 = arith.subf %26, %27 : vector<1x256xf32>
    %29 = math.absf %21 : vector<1x256xf32>
    %cst_20 = arith.constant 0.000000e+00 : f32
    %30 = vector.broadcast %cst_20 : f32 to vector<1x256xf32>
    %31 = arith.subf %30, %29 : vector<1x256xf32>
    %32 = math.exp %31 : vector<1x256xf32>
    %33 = math.log1p %32 : vector<1x256xf32>
    %34 = arith.addf %28, %33 : vector<1x256xf32>
    %cst_21 = arith.constant 5.000000e-01 : f32
    %35 = vector.broadcast %cst_21 : f32 to vector<1x256xf32>
    %36 = arith.mulf %35, %34 : vector<1x256xf32>
    %cst_22 = arith.constant 0.000000e+00 : f32
    %37 = vector.broadcast %cst_22 : f32 to vector<1x256xf32>
    %38 = arith.maximumf %15, %37 : vector<1x256xf32>
    %39 = arith.mulf %15, %18 : vector<1x256xf32>
    %40 = arith.subf %38, %39 : vector<1x256xf32>
    %41 = math.absf %15 : vector<1x256xf32>
    %cst_23 = arith.constant 0.000000e+00 : f32
    %42 = vector.broadcast %cst_23 : f32 to vector<1x256xf32>
    %43 = arith.subf %42, %41 : vector<1x256xf32>
    %44 = math.exp %43 : vector<1x256xf32>
    %45 = math.log1p %44 : vector<1x256xf32>
    %46 = arith.addf %40, %45 : vector<1x256xf32>
    %cst_24 = arith.constant 2.500000e-01 : f32
    %47 = vector.broadcast %cst_24 : f32 to vector<1x256xf32>
    %48 = arith.mulf %47, %46 : vector<1x256xf32>
    %49 = arith.addf %36, %48 : vector<1x256xf32>
    %cst_25 = arith.constant 0.000000e+00 : f32
    %50 = vector.broadcast %cst_25 : f32 to vector<1x256xf32>
    %51 = arith.maximumf %16, %50 : vector<1x256xf32>
    %52 = arith.mulf %16, %18 : vector<1x256xf32>
    %53 = arith.subf %51, %52 : vector<1x256xf32>
    %54 = math.absf %16 : vector<1x256xf32>
    %cst_26 = arith.constant 0.000000e+00 : f32
    %55 = vector.broadcast %cst_26 : f32 to vector<1x256xf32>
    %56 = arith.subf %55, %54 : vector<1x256xf32>
    %57 = math.exp %56 : vector<1x256xf32>
    %58 = math.log1p %57 : vector<1x256xf32>
    %59 = arith.addf %53, %58 : vector<1x256xf32>
    %cst_27 = arith.constant 2.500000e-01 : f32
    %60 = vector.broadcast %cst_27 : f32 to vector<1x256xf32>
    %61 = arith.mulf %60, %59 : vector<1x256xf32>
    %62 = arith.addf %49, %61 : vector<1x256xf32>
    %cst_28 = arith.constant dense<0.000000e+00> : vector<1xf32>
    %63 = vector.multi_reduction <add>, %62, %cst_28 [1] : vector<1x256xf32> to vector<1xf32>
    %64 = vector.shape_cast %63 : vector<1xf32> to vector<1x1xf32>
    %65 = tpu.iota {dimensions = array<i32: 1>} : vector<1x128xi32>
    %c0_i32 = arith.constant 0 : i32
    %66 = vector.broadcast %c0_i32 : i32 to vector<1x128xi32>
    %67 = arith.cmpi eq, %65, %66 : vector<1x128xi32>
    %cst_29 = arith.constant 0.000000e+00 : f32
    %68 = vector.shape_cast %64 : vector<1x1xf32> to vector<1x1xf32>
    %69 = vector.broadcast %68 : vector<1x1xf32> to vector<1x128xf32>
    %70 = vector.broadcast %cst_29 : f32 to vector<1x128xf32>
    %71 = arith.select %67, %69, %70 : vector<1x128xi1>, vector<1x128xf32>
    %c0_30 = arith.constant 0 : index
    %c0_31 = arith.constant 0 : index
    %c0_32 = arith.constant 0 : index
    %72 = vector.load %arg9[%c0_30, %c0_31, %c0_32] : memref<1x1x128xf32, #tpu.memory_space<vmem>>, vector<1x1x128xf32>
    %73 = vector.shape_cast %72 : vector<1x1x128xf32> to vector<1x128xf32>
    %74 = vector.shape_cast %71 : vector<1x128xf32> to vector<1x1x128xf32>
    tpu.vector_store %arg9[%c0_30, %c0_31, %c0_32], %74 {strides = array<i32>} : memref<1x1x128xf32, #tpu.memory_space<vmem>>, vector<1x1x128xf32>,
    return
  }
  func.func @transform_0(%arg0: i32, %arg1: i32) -> (i32, i32, i32) {
    %c0_i32 = arith.constant 0 : i32
    %c0_i32_0 = arith.constant 0 : i32
    return %arg0, %c0_i32, %arg1 : i32, i32, i32
  }
  func.func @transform_1(%arg0: i32, %arg1: i32) -> (i32, i32, i32) {
    %c0_i32 = arith.constant 0 : i32
    %c0_i32_0 = arith.constant 0 : i32
    return %arg0, %c0_i32, %arg1 : i32, i32, i32
  }
  func.func @transform_2(%arg0: i32, %arg1: i32) -> (i32, i32) {
    %c0_i32 = arith.constant 0 : i32
    %c0_i32_0 = arith.constant 0 : i32
    %c0_i32_1 = arith.constant 0 : i32
    return %c0_i32, %c0_i32_0 : i32, i32
  }
  func.func @transform_3(%arg0: i32, %arg1: i32) -> (i32, i32) {
    %c0_i32 = arith.constant 0 : i32
    %c0_i32_0 = arith.constant 0 : i32
    %c0_i32_1 = arith.constant 0 : i32
    return %c0_i32, %c0_i32_0 : i32, i32
  }
  func.func @transform_4(%arg0: i32, %arg1: i32) -> (i32, i32) {
    %c0_i32 = arith.constant 0 : i32
    %c0_i32_0 = arith.constant 0 : i32
    %c0_i32_1 = arith.constant 0 : i32
    return %c0_i32, %c0_i32_0 : i32, i32
  }
  func.func @transform_5(%arg0: i32, %arg1: i32) -> (i32, i32) {
    %c0_i32 = arith.constant 0 : i32
    %c0_i32_0 = arith.constant 0 : i32
    %c0_i32_1 = arith.constant 0 : i32
    return %c0_i32, %c0_i32_0 : i32, i32
  }
  func.func @transform_6(%arg0: i32, %arg1: i32) -> (i32, i32, i32) {
    %c0_i32 = arith.constant 0 : i32
    %c0_i32_0 = arith.constant 0 : i32
    return %arg0, %c0_i32, %arg1 : i32, i32, i32
  }
  func.func @transform_7(%arg0: i32, %arg1: i32) -> (i32, i32, i32) {
    %c0_i32 = arith.constant 0 : i32
    %c0_i32_0 = arith.constant 0 : i32
    return %arg0, %c0_i32, %arg1 : i32, i32, i32
  }
}

</mosaic_0001>

<bundles_post_ra>
// kernel: dual_cpd_forward.1
= control target key start
LH: loop header
LB: loop body
LE: loop exit
PB: predicated region body
PF: predicated region fallthrough
CT: control target
= control target key end

     0   :  { %s1026_s24 = smov 0   ;;  %s1028_s25 = smov 0   ;;  %s1151_s0 = inlined_call_operand.vmem [shape: bf16[2,16,256], index: 0, kind: input, shape index: {}]   ;;  %s1152_s1 = inlined_call_operand.vmem [shape: f32[2,1,256], index: 1, kind: input, shape index: {}]   ;;  %s1153_s2 = inlined_call_operand.vmem [shape: bf16[64,16], index: 2, kind: input, shape index: {}]   ;;  %s1154_s3 = inlined_call_operand.vmem [shape: f32[64,1], index: 3, kind: input, shape index: {}]   ;;  %s1155_s4 = inlined_call_operand.vmem [shape: bf16[2,64], index: 4, kind: input, shape index: {}]   ;;  %s1156_s5 = inlined_call_operand.vmem [shape: f32[2,1], index: 5, kind: input, shape index: {}]   ;;  %s1157_s6 = inlined_call_operand.vmem [shape: f32[2,1,256], index: 6, kind: output, shape index: {0}]   ;;  %s1158_s7 = inlined_call_operand.vmem [shape: f32[2,1,128], index: 7, kind: output, shape index: {1}]  }
   0x1   :  { %s1030_s26 = smov 0  }
   0x2 LB: > { %s30_s27 = sadd.s32 1, %s978_s25  ;;  %p890_p0 = scmp.ge.s32.totalorder %s982_s26, 1  ;;  %s982_s26 = sphi %s1030_s26, %s18_s26   ;;  %s978_s25 = sphi %s1028_s25, %s1162_s25   ;;  %s974_s24 = sphi %s1026_s24, %s1161_s24  }
   0x3   : > { %p32_p1 = scmp.ge.s32.totalorder %s30_s27, 2  ;;  %p279_p2 = scmp.lt.s32.totalorder %s982_s26, 3 }
   0x5   : > { %s1164_s27 = smov (%p32_p1, %s30_s27), 0  ;;  %p280_p3 = pnand %p890_p0, %p279_p2 }
   0x6   : > { %p333_p4 = scmp.lt.s32.totalorder (!%p280_p3), %s974_s24, 1  ;;  %v984_v0 = vmov (!%p280_p3), 0   ;;  %v377_v1 = vld [vmem:[%s1154_s3] sm:$0xff] (!%p280_p3)  ;;  %v378_v4 = vld [vmem:[%s1154_s3 + $0x8] sm:$0xff] (!%p280_p3)  ;;  %v379_v6 = vld [vmem:[%s1154_s3 + $0x10] sm:$0xff] (!%p280_p3)  ;;  %vm455_vm0 = vcmask (!%p280_p3), 130048  }
   0x7   : > { %283 = sbr.rel (%p280_p3) target bundleno = 680 (0x2a8), region = 44  ;;  %500 = vmatprep.mubr.bf16.mxu0 (!%p280_p3), %v984_v0  ;;  %935 = vset.pattern.permute.xlu0 (!%p280_p3), %v984_v0  ;;  %v940_v5 = vld [vmem:[%s1153_s2] sm:$0xff] (!%p280_p3)   ;;  %v380_v7 = vld [vmem:[%s1154_s3 + $0x18] sm:$0xff] (!%p280_p3)  ;;  %v382_v9 = vld [vmem:[%s1154_s3 + $0x28] sm:$0xff] (!%p280_p3)  ;;  %vm572_vm1 = vcmask (!%p280_p3), 523264   ;;  %vm744_vm7 = vcmask (!%p280_p3), 1040384  }
   0x8   : > { %936 = vset.pattern.permute.xlu1 (!%p280_p3), %v984_v0  ;;  %608 = vmatprep.mubr.bf16.mxu1 (!%p280_p3), %v984_v0  ;;  %v381_v8 = vld [vmem:[%s1154_s3 + $0x20] sm:$0xff] (!%p280_p3)  ;;  %v383_v10 = vld [vmem:[%s1154_s3 + $0x30] sm:$0xff] (!%p280_p3)  ;;  %v941_v11 = vld [vmem:[%s1153_s2 + $0x8] sm:$0xff] (!%p280_p3)  }
   0x9   : > { %387 = vperm.xlu0 (!%p280_p3), %935, %v377_v1   ;;  %397 = vperm.xlu1 (!%p280_p3), %936, %v379_v6   ;;  %v384_v12 = vld [vmem:[%s1154_s3 + $0x38] sm:$0xff] (!%p280_p3)  ;;  %v566_v13 = vld [vmem:[%s1156_s5] sm:$0x3] (!%p280_p3)  ;;  %v942_v14 = vld [vmem:[%s1153_s2 + $0x10] sm:$0xff] (!%p280_p3)  }
   0xa   : > { %v943_v15 = vld [vmem:[%s1153_s2 + $0x18] sm:$0xff] (!%p280_p3)  }
   0xd   : > { %392 = vperm.xlu0 (!%p280_p3), %935, %v378_v4   ;;  %402 = vperm.xlu1 (!%p280_p3), %936, %v380_v7  }
   0xe   : > { %s1166_s24 = smov (!%p333_p4, %s974_s24), 1 }
   0xf   : > { %s908_s28 = sshll.u32 %s1166_s24, 4  ;;  %s893_s18 = sshll.u32 %s1166_s24, 1 }
  0x10   : > { %s340_s8 = scalar_lea.vmem %s1151_s0, %s908_s28  ;;  %s358_s21 = scalar_lea.vmem %s1157_s6, %s893_s18 }
  0x11   : > { %v937_v2 = vld [vmem:[%s340_s8 + $0x4] ss:$8 sps:$4 sm:$0xff]   ;;  %v939_v3 = vld [vmem:[%s340_s8] ss:$8 sps:$4 sm:$0xff]   ;;  %407 = vperm.xlu0 %935, %v381_v8   ;;  %412 = vperm.xlu1 %936, %v382_v9   ;;  %s349_s28 = scalar_lea.vmem %s1152_s1, %s893_s18  ;;  %s365_s8 = scalar_lea.vmem %s1158_s7, %s1166_s24 }
  0x12   : > { %468 = vmatprep.subr.bf16.mxu0 %v937_v2 }
  0x13   : > { %469 = vmatpush1.bf16.msra.mxu0 %v939_v3 }
  0x15   : > { %417 = vperm.xlu0 %935, %v383_v10   ;;  %422 = vperm.xlu1 %936, %v384_v12  }
  0x16   : > { %901 = vmatmul.mubr.msk.bf16.vlgmr.msra.gmra.mrb[0].mxu0 %vm455_vm0, %v940_v5 }
  0x17   : > { %510 = vmatprep.mubr.bf16.mxu0 %v984_v0 }
  0x19   : > { %569 = vperm.xlu0 %935, %v566_v13  }
  0x1e   : > { %902 = vmatmul.mubr.msk.bf16.gmra.mrb[4].mxu0 %vm455_vm0, %v941_v11 }
  0x1f   : > { %520 = vmatprep.mubr.bf16.mxu0 %v984_v0 }
  0x26   : > { %903 = vmatmul.mubr.msk.bf16.gmra.mrb[8].mxu0 %vm455_vm0, %v942_v14 }
  0x27   : > { %530 = vmatprep.mubr.bf16.mxu0 %v984_v0 }
  0x2e   : > { %904 = vmatmul.mubr.msk.bf16.gmra.mrb[12].mxu0 %vm455_vm0, %v943_v15 }
  0x88   : > { %v388_v16 = vpop.permute.xlu0 %387  ;;  %v398_v25 = vpop.permute.xlu1 %397 }
  0x8c   : > { %v393_v20 = vpop.permute.xlu0 %392  ;;  %v403_v36 = vpop.permute.xlu1 %402 }
  0x90   : > { %v408_v47 = vpop.permute.xlu0 %407  ;;  %v413_v52 = vpop.permute.xlu1 %412 }
  0x94   : > { %v418_v63 = vpop.permute.xlu0 %417  ;;  %v423_v4 = vpop.permute.xlu1 %422 }
  0xe9   : > { %v502_v17 = vpop.f32.mrb[0].mxu0 }
  0xea   : > { %v503_v18 = vadd.f32 %v502_v17, %v388_v16  ;;  %v504_v19 = vpop.f32.mrb[1].mxu0  ;;  %v985_v17 = vmov 1966171168  }
  0xeb   : > { %v505_v21 = vadd.f32 %v504_v19, %v388_v16  ;;  %v506_v22 = vpop.f32.mrb[2].mxu0  ;;  %v557_v16 = vld [vmem:[%s1155_s4] sm:$0x1]  ;;  %v570_v19 = vpop.permute.xlu0 %569 }
  0xec   : > { %v507_v23 = vadd.f32 %v506_v22, %v393_v20  ;;  %v508_v24 = vpop.f32.mrb[3].mxu0  ;;  %v541_v27 = vmax.f32 %v503_v18, 0.0  ;;  %v632_v18 = vunpack.c.l.s4 %v985_v17 }
  0xed   : > { %v509_v26 = vadd.f32 %v508_v24, %v393_v20  ;;  %v542_v29 = vmax.f32 %v505_v21, 0.0 }
  0xee   : > { %v543_v28 = vmax.f32 %v507_v23, 0.0  ;;  %v634_v23 = vlaneseq }
  0xef   : > { %v544_v30 = vmax.f32 %v509_v26, 0.0 }
  0xf0   : > { %v558_v31 = vpack.c.bf16 %v543_v28, %v541_v27  ;;  %vm648_vm2 = vcmp.lt.s32.totalorder %v634_v23, 256 }
  0xf1   : > { %v512_v32 = vpop.f32.mrb[4].mxu0  ;;  %v559_v33 = vpack.c.bf16 %v544_v30, %v542_v29  ;;  %v633_v29 = vunpack.c.0.s8 %v632_v18 }
  0xf2   : > { %v513_v34 = vadd.f32 %v512_v32, %v398_v25  ;;  %v514_v35 = vpop.f32.mrb[5].mxu0 }
  0xf3   : > { %v515_v37 = vadd.f32 %v514_v35, %v398_v25  ;;  %v516_v38 = vpop.f32.mrb[6].mxu0  ;;  %576 = vmatprep.subr.bf16.mxu1 %v559_v33 }
  0xf4   : > { %v517_v39 = vadd.f32 %v516_v38, %v403_v36  ;;  %v518_v40 = vpop.f32.mrb[7].mxu0  ;;  %577 = vmatpush1.bf16.msra.mxu1 %v558_v31  ;;  %v545_v42 = vmax.f32 %v513_v34, 0.0  ;;  %v635_v34 = vshrl.u32 %v634_v23, 7 }
  0xf5   : > { %v519_v41 = vadd.f32 %v518_v40, %v403_v36  ;;  %v546_v44 = vmax.f32 %v515_v37, 0.0 }
  0xf6   : > { %v547_v43 = vmax.f32 %v517_v39, 0.0  ;;  %v636_v39 = vsub.s32 %v633_v29, %v635_v34 }
  0xf7   : > { %v548_v45 = vmax.f32 %v519_v41, 0.0 }
  0xf8   : > { %v560_v46 = vpack.c.bf16 %v547_v43, %v545_v42 }
  0xf9   : > { %v561_v48 = vpack.c.bf16 %v548_v45, %v546_v44  ;;  %v522_v49 = vpop.f32.mrb[8].mxu0 }
  0xfa   : > { %v523_v50 = vadd.f32 %v522_v49, %v408_v47  ;;  %v524_v51 = vpop.f32.mrb[9].mxu0 }
  0xfb   : > { %v525_v53 = vadd.f32 %v524_v51, %v408_v47  ;;  %v526_v54 = vpop.f32.mrb[10].mxu0  ;;  %578 = vmatprep.subr.bf16.mxu1 %v561_v48 }
  0xfc   : > { %v527_v55 = vadd.f32 %v526_v54, %v413_v52  ;;  %v528_v56 = vpop.f32.mrb[11].mxu0  ;;  %579 = vmatpush1.bf16.msra.mxu1 %v560_v46  ;;  %v549_v58 = vmax.f32 %v523_v50, 0.0 }
  0xfd   : > { %v529_v57 = vadd.f32 %v528_v56, %v413_v52  ;;  %v550_v60 = vmax.f32 %v525_v53, 0.0  ;;  %v617_v56 = vld [vmem:[%s349_s28] sm:$0x3] }
  0xfe   : > { %v551_v59 = vmax.f32 %v527_v55, 0.0  ;;  %v656_v55 = vsub.s32 0, %v635_v34 }
  0xff   : > { %v552_v61 = vmax.f32 %v529_v57, 0.0 }
 0x100   : > { %v562_v62 = vpack.c.bf16 %v551_v59, %v549_v58  ;;  %v660_v58 = vsub.s32 1, %v635_v34 }
 0x101   : > { %v563_v0 = vpack.c.bf16 %v552_v61, %v550_v60  ;;  %v532_v1 = vpop.f32.mrb[12].mxu0  ;;  %v657_v61 = vrot.slane %v617_v56, %v656_v55 }
 0x102   : > { %v533_v2 = vadd.f32 %v532_v1, %v418_v63  ;;  %v534_v3 = vpop.f32.mrb[13].mxu0  ;;  %v661_v1 = vrot.slane %v617_v56, %v660_v58 }
 0x103   : > { %v535_v5 = vadd.f32 %v534_v3, %v418_v63  ;;  %v536_v6 = vpop.f32.mrb[14].mxu0  ;;  %580 = vmatprep.subr.bf16.mxu1 %v563_v0 }
 0x104   : > { %v537_v7 = vadd.f32 %v536_v6, %v423_v4  ;;  %v538_v8 = vpop.f32.mrb[15].mxu0  ;;  %581 = vmatpush1.bf16.msra.mxu1 %v562_v62  ;;  %v553_v10 = vmax.f32 %v533_v2, 0.0 }
 0x105   : > { %v539_v9 = vadd.f32 %v538_v8, %v423_v4  ;;  %v554_v12 = vmax.f32 %v535_v5, 0.0 }
 0x106   : > { %v555_v11 = vmax.f32 %v537_v7, 0.0 }
 0x107   : > { %v556_v13 = vmax.f32 %v539_v9, 0.0 }
 0x108   : > { %v564_v14 = vpack.c.bf16 %v555_v11, %v553_v10 }
 0x109   : > { %v565_v15 = vpack.c.bf16 %v556_v13, %v554_v12 }
 0x10b   : > { %582 = vmatprep.subr.bf16.mxu1 %v565_v15 }
 0x10c   : > { %583 = vmatpush1.bf16.msra.mxu1 %v564_v14 }
 0x10f   : > { %905 = vmatmul.mubr.msk.bf16.vlgmr.msra.gmra.mrb[0].mxu1 %vm572_vm1, %v557_v16 }
 0x1e2   : > { %v610_v20 = vpop.f32.mrb[0].mxu1 }
 0x1e3   : > { %v1096_v21 = vadd.f32 %v610_v20, %v570_v19  ;;  %v612_v22 = vpop.f32.mrb[1].mxu1 }
 0x1e4   : > { %v1098_v24 = vadd.f32 %v612_v22, %v570_v19  ;;  %v614_v25 = vpop.f32.mrb[2].mxu1 }
 0x1e5   : > { %v620_v26 = vrot.slane %v1096_v21, 1  ;;  %v704_v27 = vand.u32 2147483647, %v1096_v21  ;;  %v615_v28 = vpop.f32.mrb[3].mxu1  ;;  %v698_v3 = vmax.f32 %v1096_v21, 0.0  ;;  %v700_v4 = vmul.f32 %v657_v61, %v1096_v21 }
 0x1e6   : > { %v621_v30 = vrot.slane %v1098_v24, 1  ;;  %v705_v31 = vand.u32 2147483647, %v1098_v24  ;;  %v699_v12 = vmax.f32 %v1098_v24, 0.0  ;;  %v701_v13 = vmul.f32 %v661_v1, %v1098_v24 }
 0x1e7   : > { %v624_v32 = vadd.f32 %v620_v26, %v1096_v21  ;;  %v706_v33 = vsub.f32 0.0, %v704_v27  ;;  %v702_v16 = vsub.f32 %v698_v3, %v700_v4 }
 0x1e8   : > { %v625_v35 = vadd.f32 %v621_v30, %v1098_v24  ;;  %v707_v36 = vsub.f32 0.0, %v705_v31  ;;  %v703_v31 = vsub.f32 %v699_v12, %v701_v13 }
 0x1e9   : > { %v1107_v37 = vmul.f32 0.5, %v624_v32  ;;  %v708_v38 = vmul.f32 1.442695, %v706_v33 }
 0x1ea   : > { %v1109_v40 = vmul.f32 0.5, %v625_v35  ;;  %v710_v41 = vmul.f32 1.442695, %v707_v36 }
 0x1eb   : > { %v668_v42 = vand.u32 2147483647, %v1107_v37  ;;  %944 = vpow2.f32 %v708_v38  ;;  %v651_v20 = vmax.f32 %v1107_v37, 0.0  ;;  %v664_v25 = vmul.f32 %v657_v61, %v1107_v37 }
 0x1ec   : > { %v630_v43 = vcombine.low %v1107_v37, %v1109_v40  ;;  %v669_v44 = vand.u32 2147483647, %v1109_v40  ;;  %946 = vpow2.f32 %v710_v41  ;;  %v652_v28 = vmax.f32 %v1109_v40, 0.0 }
 0x1ed   : > { %v670_v45 = vsub.f32 0.0, %v668_v42  ;;  %v665_v29 = vmul.f32 %v661_v1, %v1109_v40 }
 0x1ee   : > { %v637_v46 = vrot.slane %v630_v43, %v636_v39  ;;  %v671_v47 = vsub.f32 0.0, %v669_v44 }
 0x1ef   : > { %v672_v48 = vmul.f32 1.442695, %v670_v45  ;;  %v667_v37 = vsub.f32 %v652_v28, %v665_v29 }
 0x1f0   : > { %v644_v49 = vrot.slane %v637_v46, %v636_v39  ;;  %v674_v50 = vmul.f32 1.442695, %v671_v47  ;;  %v666_v39 = vsub.f32 %v651_v20, %v664_v25 }
 0x1f1   : > { %948 = vpow2.f32 %v672_v48 }
 0x1f2   : > { %650 = vst.msk [vmem:[%s358_s21] sm:$0x3] %vm648_vm2, %v644_v49  ;;  %950 = vpow2.f32 %v674_v50 }
 0x1f5   : > { %v945_v51 = vpop.eup %944 }
 0x1f6   : > { %v947_v52 = vpop.eup %946  ;;  %v712_v53 = vadd.f32 1.0, %v945_v51  ;;  %v715_v59 = vmul.f32 -0.5, %v945_v51  ;;  %v718_v5 = vand.u32 2147483647, %v945_v51 }
 0x1f7   : > { %v721_v54 = vadd.f32 1.0, %v947_v52  ;;  %v724_v63 = vmul.f32 -0.5, %v947_v52  ;;  %v727_v8 = vand.u32 2147483647, %v947_v52 }
 0x1f8   : > { %952 = vlog2.f32 %v712_v53  ;;  %v716_v2 = vadd.f32 1.0, %v715_v59  ;;  %vm1127_vm3 = vcmp.lt.f32.partialorder %v718_v5, 0.0004427343  ;;  %v751_v59 = vand.u32 127, %v634_v23 }
 0x1f9   : > { %954 = vlog2.f32 %v721_v54  ;;  %v725_v6 = vadd.f32 1.0, %v724_v63  ;;  %vm728_vm4 = vcmp.lt.f32.partialorder %v727_v8, 0.0004427343 }
 0x1fa   : > { %v717_v15 = vmul.f32 %v945_v51, %v716_v2  ;;  %vm752_vm8 = vcmp.eq.s32.totalorder %v751_v59, 0 }
 0x1fb   : > { %v949_v57 = vpop.eup %948  ;;  %v726_v19 = vmul.f32 %v947_v52, %v725_v6 }
 0x1fc   : > { %v951_v60 = vpop.eup %950  ;;  %v676_v62 = vadd.f32 1.0, %v949_v57  ;;  %v679_v7 = vmul.f32 -0.5, %v949_v57  ;;  %v682_v26 = vand.u32 2147483647, %v949_v57 }
 0x1fd   : > { %v685_v0 = vadd.f32 1.0, %v951_v60  ;;  %v688_v10 = vmul.f32 -0.5, %v951_v60  ;;  %v691_v30 = vand.u32 2147483647, %v951_v60 }
 0x1fe   : > { %956 = vlog2.f32 %v676_v62  ;;  %v680_v21 = vadd.f32 1.0, %v679_v7  ;;  %vm683_vm5 = vcmp.lt.f32.partialorder %v682_v26, 0.0004427343 }
 0x1ff   : > { %958 = vlog2.f32 %v685_v0  ;;  %v689_v24 = vadd.f32 1.0, %v688_v10  ;;  %vm692_vm6 = vcmp.lt.f32.partialorder %v691_v30, 0.0004427343 }
 0x200   : > { %v681_v36 = vmul.f32 %v949_v57, %v680_v21 }
 0x201   : > { %v690_v42 = vmul.f32 %v951_v60, %v689_v24 }
 0x202   : > { %v953_v9 = vpop.eup %952 }
 0x203   : > { %v955_v11 = vpop.eup %954  ;;  %v714_v14 = vmul.f32 0.6931472, %v953_v9 }
 0x204   : > { %v723_v18 = vmul.f32 0.6931472, %v955_v11 }
 0x205   : > { %v720_v22 = vsel %vm1127_vm3, %v717_v15, %v714_v14 }
 0x206   : > { %v729_v27 = vsel %vm728_vm4, %v726_v19, %v723_v18  ;;  %v730_v33 = vadd.f32 %v720_v22, %v702_v16 }
 0x207   : > { %v731_v38 = vadd.f32 %v729_v27, %v703_v31 }
 0x208   : > { %v957_v32 = vpop.eup %956  ;;  %v732_v46 = vmul.f32 0.25, %v730_v33 }
 0x209   : > { %v959_v34 = vpop.eup %958  ;;  %v678_v35 = vmul.f32 0.6931472, %v957_v32  ;;  %v733_v40 = vmul.f32 0.25, %v731_v38 }
 0x20a   : > { %v687_v41 = vmul.f32 0.6931472, %v959_v34  ;;  %v738_v51 = vrot.slane %v732_v46, 1 }
 0x20b   : > { %v684_v43 = vsel %vm683_vm5, %v681_v36, %v678_v35  ;;  %v739_v53 = vrot.slane %v733_v40, 1 }
 0x20c   : > { %v693_v44 = vsel %vm692_vm6, %v690_v42, %v687_v41  ;;  %v694_v45 = vadd.f32 %v684_v43, %v666_v39 }
 0x20d   : > { %v695_v47 = vadd.f32 %v693_v44, %v667_v37 }
 0x20e   : > { %v696_v48 = vmul.f32 0.5, %v694_v45 }
 0x20f   : > { %v697_v49 = vmul.f32 0.5, %v695_v47 }
 0x210   : > { %v734_v50 = vadd.f32 %v732_v46, %v696_v48 }
 0x211   : > { %v735_v52 = vadd.f32 %v733_v40, %v697_v49 }
 0x212   : > { %v742_v54 = vadd.f32 %v738_v51, %v734_v50 }
 0x213   : > { %v743_v55 = vadd.f32 %v739_v53, %v735_v52 }
 0x214   : > { %v745_v56 = vsel %vm744_vm7, %v742_v54, 0.0 }
 0x215   : > { %v746_v57 = vsel %vm744_vm7, %v743_v55, 0.0 }
 0x216   : > { %v747_v58 = vadd.f32 %v746_v57, %v745_v56 }
 0x218   : > { %748 = vadd.xlane.f32.xlu1 %v747_v58 }
 0x2a5   : > { %v749_v60 = vpop.xlane.xlu1 %748 }
 0x2a6   : > { %v753_v61 = vsel %vm752_vm8, %v749_v60, 0.0 }
 0x2a7   : > { %754 = vst [vmem:[%s365_s8] sm:$0x1] %v753_v61 }
 0x2a8 PF: > { %s18_s26 = sadd.s32 1, %s982_s26   ;;  %s1161_s24 = smov %s978_s25 }
 0x2a9   : > { %p15_p5 = scmp.ge.s32.totalorder %s18_s26, 4   ;;  %s1162_s25 = smov %s1164_s27 }
 0x2ab   :  { %17 = sbr.rel (!%p15_p5) target bundleno = 2 (0x2), region = 89 }

</bundles_post_ra>
